<compile_context>
chip_gen: v7x
topology: tpu7x:2x2x1
jax: 0.10.0
libtpu: 0.0.40
codegen_flags: <defaults>
</compile_context>

<pallas_src>
import math

import jax
import jax.numpy as jnp
from jax.experimental import pallas as pl
from jax.experimental.pallas import tpu as pltpu


def _round_up(n, m):
    return (n + m - 1) // m * m


def _layernorm_cols(h, gamma, beta, eps=1e-5):
    """LayerNorm over axis 0 of an (H, TM) tile (batch on the lane axis).

    PyTorch-style: biased variance, eps inside rsqrt.  One-pass stats with the
    variance clamped at zero (cancellation safety)."""
    n = h.shape[0]
    inv_n = 1.0 / n
    s1 = jnp.sum(h, axis=0, keepdims=True)          # (1, TM)
    s2 = jnp.sum(h * h, axis=0, keepdims=True)      # (1, TM)
    mu = s1 * inv_n
    var = jnp.maximum(s2 * inv_n - mu * mu, 0.0)
    return (h - mu) * jax.lax.rsqrt(var + eps) * gamma + beta


def critic_kernel(xT_ref,
                  w1_ref, b1_ref, g1_ref, be1_ref,
                  w2_ref, b2_ref, g2_ref, be2_ref,
                  w3_ref, b3_ref,
                  o_ref):
    bf16 = jnp.bfloat16

    # Layer 1: W1(H, d_in) @ x^T(d_in, TM) -> (H, TM), f32 accumulation.
    # (obs||act concat was fused into x^T in the wrapper; operands already bf16.)
    h = jnp.dot(w1_ref[...], xT_ref[...], preferred_element_type=jnp.float32)
    h = h + b1_ref[...]
    h = _layernorm_cols(h, g1_ref[...], be1_ref[...])
    h = jnp.maximum(h, 0.0)

    # Layer 2: W2(H, H) @ h(H, TM) -> (H, TM).
    h = jnp.dot(w2_ref[...], h.astype(bf16),
                preferred_element_type=jnp.float32) + b2_ref[...]
    h = _layernorm_cols(h, g2_ref[...], be2_ref[...])
    h = jnp.maximum(h, 0.0)

    # Output head: (1, H) @ (H, TM) -> (1, TM); lane-dense unmasked store.
    o = jnp.dot(w3_ref[...], h.astype(bf16), preferred_element_type=jnp.float32)
    o_ref[...] = o + b3_ref[0, 0]


def critic_forward(inputs, agent_actions, params, *, tm_max=1024):
    """Forward pass.  `agent_actions` carries both agent and opponent actions
    (the PyTorch forward only concatenates two tensors)."""
    inputs = jnp.asarray(inputs, jnp.float32)
    agent_actions = jnp.asarray(agent_actions, jnp.float32)
    (w1, b1, g1, be1, w2, b2, g2, be2, w3, b3) = params

    B = inputs.shape[0]
    H, d_in = w1.shape

    # Fused concat -> transpose -> bf16: the kernel streams x^T = (d_in, B) with
    # the batch on the lane axis; no per-step casts inside the kernel.
    xT = jnp.concatenate([inputs, agent_actions], axis=1).T.astype(jnp.bfloat16)

    # Pad batch to a multiple of 128 (full lane-dense out blocks / MXU tiles).
    # Pick tm so there are >= 2 balanced tiles once b_pad >= 256 (v7x has two
    # TensorCores), capped at tm_max (grid-step overhead amortization for the
    # single-TC v5e/v6e).  VMEM is never the constraint at these shapes.
    b128 = _round_up(B, 128)
    tm = min(tm_max, max(128, _round_up(-(-b128 // 2), 128)))
    b_pad = _round_up(b128, tm)
    if b_pad != B:
        xT = jnp.pad(xT, ((0, 0), (0, b_pad - B)))

    grid = (b_pad // tm,)
    const = lambda shape: pl.BlockSpec(shape, lambda i: (0, 0))   # VMEM-resident

    out_row = pl.pallas_call(
        critic_kernel,
        out_shape=jax.ShapeDtypeStruct((1, b_pad), jnp.float32),
        grid=grid,
        in_specs=[
            pl.BlockSpec((d_in, tm), lambda i: (0, i)),            # x^T streamed (bf16)
            const((H, d_in)),                                      # W1 (bf16)
            const((H, 1)),                                         # b1
            const((H, 1)),                                         # gamma1
            const((H, 1)),                                         # beta1
            const((H, H)),                                         # W2 (bf16)
            const((H, 1)),                                         # b2
            const((H, 1)),                                         # gamma2
            const((H, 1)),                                         # beta2
            const((1, H)),                                         # W3 (bf16)
            pl.BlockSpec(memory_space=pltpu.MemorySpace.SMEM),     # b3 scalar
        ],
        out_specs=pl.BlockSpec((1, tm), lambda i: (0, i)),
        compiler_params=pltpu.CompilerParams(
            dimension_semantics=("parallel",)),
    )(xT, w1, b1, g1, be1, w2, b2, g2, be2, w3, b3)

    return out_row[0, :B].reshape(B, 1)


def init_params(key, input_size, hidden, agent_act, oppo_act):
    """Deterministic init mirroring the PyTorch __init__ (uniform, 1/sqrt(inputSize)).

    Weights are stored bf16 (kernel-ready); biases / LayerNorm params stay f32.
    Layout is the transposed one the kernel consumes: W1 (H, d_in), W2 (H, H),
    W3 (1, H), vectors as (H, 1)."""
    d_in = input_size + agent_act + oppo_act
    ks = jax.random.split(key, 6)
    s = 1.0 / math.sqrt(input_size)

    def u(k, shape, scale):
        return 2.0 * scale * jax.random.uniform(k, shape, dtype=jnp.float32) - scale

    w1 = u(ks[0], (hidden, d_in), s).astype(jnp.bfloat16)
    b1 = u(ks[1], (hidden, 1), s)
    w2 = u(ks[2], (hidden, hidden), s).astype(jnp.bfloat16)
    b2 = u(ks[3], (hidden, 1), s)
    w3 = u(ks[4], (1, hidden), 0.003).astype(jnp.bfloat16)
    b3 = u(ks[5], (1, 1), 0.003)

    g1 = jnp.ones((hidden, 1), jnp.float32)
    be1 = jnp.zeros((hidden, 1), jnp.float32)
    g2 = jnp.ones((hidden, 1), jnp.float32)
    be2 = jnp.zeros((hidden, 1), jnp.float32)

    return (w1, b1, g1, be1, w2, b2, g2, be2, w3, b3)


def _layernorm_rows(h, gamma_row, beta_row, eps=1e-5):
    """Reference LayerNorm over the last axis of (B, H), same clamped one-pass stats."""
    n = h.shape[-1]
    inv_n = 1.0 / n
    s1 = jnp.sum(h, axis=-1, keepdims=True)
    s2 = jnp.sum(h * h, axis=-1, keepdims=True)
    mu = s1 * inv_n
    var = jnp.maximum(s2 * inv_n - mu * mu, 0.0)
    return (h - mu) * jax.lax.rsqrt(var + eps) * gamma_row + beta_row


def _reference_matched(inputs, agent_actions, params):
    """Pure-JAX reference using the same bf16 matmul operands / f32 accumulation."""
    (w1, b1, g1, be1, w2, b2, g2, be2, w3, b3) = params
    bf16 = jnp.bfloat16
    x = jnp.concatenate([inputs, agent_actions], axis=1).astype(bf16)
    h = jnp.dot(x, w1.T, preferred_element_type=jnp.float32) + b1.T
    h = _layernorm_rows(h, g1.T, be1.T)
    h = jnp.maximum(h, 0.0)
    h = jnp.dot(h.astype(bf16), w2.T, preferred_element_type=jnp.float32) + b2.T
    h = _layernorm_rows(h, g2.T, be2.T)
    h = jnp.maximum(h, 0.0)
    return jnp.dot(h.astype(bf16), w3.T, preferred_element_type=jnp.float32) + b3


def _reference_f32(inputs, agent_actions, params):
    """Pure-f32 reference (exact PyTorch math for the bf16-stored weight values)."""
    (w1, b1, g1, be1, w2, b2, g2, be2, w3, b3) = params
    f32 = jnp.float32
    x = jnp.concatenate([inputs, agent_actions], axis=1)
    h = x @ w1.astype(f32).T + b1.T
    h = _layernorm_rows(h, g1.T, be1.T)
    h = jnp.maximum(h, 0.0)
    h = h @ w2.astype(f32).T + b2.T
    h = _layernorm_rows(h, g2.T, be2.T)
    h = jnp.maximum(h, 0.0)
    return h @ w3.astype(f32).T + b3


if __name__ == "__main__":
    # TODO(synk): at these tiny per-call shapes the kernel is launch/DMA-overhead
    # bound; for real multi-agent deployments, batch many critics into one
    # pallas_call (stack weights on a leading grid axis, or pack 4 critics along
    # the feature axis so the hidden dim reaches a full 128-lane vreg).
    input_size = 16
    agent_act = 4
    oppo_act = 4
    hidden = 32
    batch = 8

    key = jax.random.PRNGKey(0)
    k_param, k_x, k_a, k_x2, k_a2 = jax.random.split(key, 5)

    params = init_params(k_param, input_size, hidden, agent_act, oppo_act)
    inputs = jax.random.normal(k_x, (batch, input_size), dtype=jnp.float32)
    actions = jax.random.normal(k_a, (batch, agent_act + oppo_act), dtype=jnp.float32)

    out = jax.block_until_ready(critic_forward(inputs, actions, params))
    assert out.shape == (batch, 1), out.shape

    ref_matched = _reference_matched(inputs, actions, params)
    ref_f32 = _reference_f32(inputs, actions, params)
    assert jnp.allclose(out, ref_matched, atol=2e-4, rtol=1e-3), "mismatch vs matched (bf16-matmul) reference"
    assert jnp.allclose(out, ref_f32, atol=2e-2, rtol=2e-2), "mismatch vs f32 reference"

    # Exercise the multi-tile / padded-batch path (grid=2, balanced tiles, lane-dense blocks).
    batch2 = 1000
    inputs2 = jax.random.normal(k_x2, (batch2, input_size), dtype=jnp.float32)
    actions2 = jax.random.normal(k_a2, (batch2, agent_act + oppo_act), dtype=jnp.float32)
    out2 = jax.block_until_ready(critic_forward(inputs2, actions2, params))
    assert out2.shape == (batch2, 1), out2.shape
    ref2 = _reference_matched(inputs2, actions2, params)
    assert jnp.allclose(out2, ref2, atol=2e-4, rtol=1e-3), "mismatch vs reference (multi-tile path)"

    print("KERNEL_OK")
</pallas_src>

<mosaic_0001>
module attributes {stable_mosaic.version = 11 : i64} {
  func.func @critic_kernel(%arg0: i32, %arg1: memref<24x128xbf16, #tpu.memory_space<vmem>>, %arg2: memref<32x24xbf16, #tpu.memory_space<vmem>>, %arg3: memref<32x1xf32, #tpu.memory_space<vmem>>, %arg4: memref<32x1xf32, #tpu.memory_space<vmem>>, %arg5: memref<32x1xf32, #tpu.memory_space<vmem>>, %arg6: memref<32x32xbf16, #tpu.memory_space<vmem>>, %arg7: memref<32x1xf32, #tpu.memory_space<vmem>>, %arg8: memref<32x1xf32, #tpu.memory_space<vmem>>, %arg9: memref<32x1xf32, #tpu.memory_space<vmem>>, %arg10: memref<1x32xbf16, #tpu.memory_space<vmem>>, %arg11: memref<1x1xf32, #tpu.memory_space<smem>>, %arg12: memref<1x128xf32, #tpu.memory_space<vmem>>) attributes {dimension_semantics = [#tpu.dimension_semantics<parallel>], iteration_bounds = array<i64: 1>, scalar_prefetch = 0 : i64, scratch_operands = 0 : i64, tpu.core_type = #tpu.core_type<tc>, window_params = [{transform_indices = @transform_0, window_bounds = array<i64: 24, 128>}, {pipeline_mode = #tpu.pipeline_mode<synchronous>, transform_indices = @transform_1, window_bounds = array<i64: 32, 24>}, {pipeline_mode = #tpu.pipeline_mode<synchronous>, transform_indices = @transform_2, window_bounds = array<i64: 32, 1>}, {pipeline_mode = #tpu.pipeline_mode<synchronous>, transform_indices = @transform_3, window_bounds = array<i64: 32, 1>}, {pipeline_mode = #tpu.pipeline_mode<synchronous>, transform_indices = @transform_4, window_bounds = array<i64: 32, 1>}, {pipeline_mode = #tpu.pipeline_mode<synchronous>, transform_indices = @transform_5, window_bounds = array<i64: 32, 32>}, {pipeline_mode = #tpu.pipeline_mode<synchronous>, transform_indices = @transform_6, window_bounds = array<i64: 32, 1>}, {pipeline_mode = #tpu.pipeline_mode<synchronous>, transform_indices = @transform_7, window_bounds = array<i64: 32, 1>}, {pipeline_mode = #tpu.pipeline_mode<synchronous>, transform_indices = @transform_8, window_bounds = array<i64: 32, 1>}, {pipeline_mode = #tpu.pipeline_mode<synchronous>, transform_indices = @transform_9, window_bounds = array<i64: 1, 32>}, {transform_indices = @transform_10, window_bounds = array<i64: 1, 1>}, {transform_indices = @transform_11, window_bounds = array<i64: 1, 128>}]} {
    %c0 = arith.constant 0 : index
    %c0_0 = arith.constant 0 : index
    %0 = vector.load %arg2[%c0, %c0_0] : memref<32x24xbf16, #tpu.memory_space<vmem>>, vector<32x24xbf16>
    %c0_1 = arith.constant 0 : index
    %c0_2 = arith.constant 0 : index
    %1 = vector.load %arg1[%c0_1, %c0_2] : memref<24x128xbf16, #tpu.memory_space<vmem>>, vector<24x128xbf16>
    %cst = arith.constant dense<0.000000e+00> : vector<32x128xf32>
    %2 = tpu.matmul %0, %1, %cst {dimension_numbers = #tpu.dot_dimension_numbers<[1], [0], [0], [1], [0, 0, 1, 1], [], []>} : vector<32x24xbf16>, vector<24x128xbf16>, vector<32x128xf32> -> vector<32x128xf32>
    %c0_3 = arith.constant 0 : index
    %c0_4 = arith.constant 0 : index
    %3 = vector.load %arg3[%c0_3, %c0_4] : memref<32x1xf32, #tpu.memory_space<vmem>>, vector<32x1xf32>
    %4 = vector.broadcast %3 : vector<32x1xf32> to vector<32x128xf32>
    %5 = arith.addf %2, %4 : vector<32x128xf32>
    %c0_5 = arith.constant 0 : index
    %c0_6 = arith.constant 0 : index
    %6 = vector.load %arg4[%c0_5, %c0_6] : memref<32x1xf32, #tpu.memory_space<vmem>>, vector<32x1xf32>
    %c0_7 = arith.constant 0 : index
    %c0_8 = arith.constant 0 : index
    %7 = vector.load %arg5[%c0_7, %c0_8] : memref<32x1xf32, #tpu.memory_space<vmem>>, vector<32x1xf32>
    %cst_9 = arith.constant dense<0.000000e+00> : vector<128xf32>
    %8 = vector.multi_reduction <add>, %5, %cst_9 [0] : vector<32x128xf32> to vector<128xf32>
    %9 = vector.shape_cast %8 : vector<128xf32> to vector<1x128xf32>
    %10 = arith.mulf %5, %5 : vector<32x128xf32>
    %cst_10 = arith.constant dense<0.000000e+00> : vector<128xf32>
    %11 = vector.multi_reduction <add>, %10, %cst_10 [0] : vector<32x128xf32> to vector<128xf32>
    %12 = vector.shape_cast %11 : vector<128xf32> to vector<1x128xf32>
    %cst_11 = arith.constant 3.125000e-02 : f32
    %13 = vector.broadcast %cst_11 : f32 to vector<1x128xf32>
    %14 = arith.mulf %9, %13 : vector<1x128xf32>
    %cst_12 = arith.constant 3.125000e-02 : f32
    %15 = vector.broadcast %cst_12 : f32 to vector<1x128xf32>
    %16 = arith.mulf %12, %15 : vector<1x128xf32>
    %17 = arith.mulf %14, %14 : vector<1x128xf32>
    %18 = arith.subf %16, %17 : vector<1x128xf32>
    %cst_13 = arith.constant 0.000000e+00 : f32
    %19 = vector.broadcast %cst_13 : f32 to vector<1x128xf32>
    %20 = arith.maximumf %18, %19 : vector<1x128xf32>
    %21 = vector.broadcast %14 : vector<1x128xf32> to vector<32x128xf32>
    %22 = arith.subf %5, %21 : vector<32x128xf32>
    %cst_14 = arith.constant 9.99999974E-6 : f32
    %23 = vector.broadcast %cst_14 : f32 to vector<1x128xf32>
    %24 = arith.addf %20, %23 : vector<1x128xf32>
    %25 = math.rsqrt %24 : vector<1x128xf32>
    %26 = vector.broadcast %25 : vector<1x128xf32> to vector<32x128xf32>
    %27 = arith.mulf %22, %26 : vector<32x128xf32>
    %28 = vector.broadcast %6 : vector<32x1xf32> to vector<32x128xf32>
    %29 = arith.mulf %27, %28 : vector<32x128xf32>
    %30 = vector.broadcast %7 : vector<32x1xf32> to vector<32x128xf32>
    %31 = arith.addf %29, %30 : vector<32x128xf32>
    %cst_15 = arith.constant 0.000000e+00 : f32
    %32 = vector.broadcast %cst_15 : f32 to vector<32x128xf32>
    %33 = arith.maximumf %31, %32 : vector<32x128xf32>
    %c0_16 = arith.constant 0 : index
    %c0_17 = arith.constant 0 : index
    %34 = vector.load %arg6[%c0_16, %c0_17] : memref<32x32xbf16, #tpu.memory_space<vmem>>, vector<32x32xbf16>
    %35 = arith.truncf %33 : vector<32x128xf32> to vector<32x128xbf16>
    %cst_18 = arith.constant dense<0.000000e+00> : vector<32x128xf32>
    %36 = tpu.matmul %34, %35, %cst_18 {dimension_numbers = #tpu.dot_dimension_numbers<[1], [0], [0], [1], [0, 0, 1, 1], [], []>} : vector<32x32xbf16>, vector<32x128xbf16>, vector<32x128xf32> -> vector<32x128xf32>
    %c0_19 = arith.constant 0 : index
    %c0_20 = arith.constant 0 : index
    %37 = vector.load %arg7[%c0_19, %c0_20] : memref<32x1xf32, #tpu.memory_space<vmem>>, vector<32x1xf32>
    %38 = vector.broadcast %37 : vector<32x1xf32> to vector<32x128xf32>
    %39 = arith.addf %36, %38 : vector<32x128xf32>
    %c0_21 = arith.constant 0 : index
    %c0_22 = arith.constant 0 : index
    %40 = vector.load %arg8[%c0_21, %c0_22] : memref<32x1xf32, #tpu.memory_space<vmem>>, vector<32x1xf32>
    %c0_23 = arith.constant 0 : index
    %c0_24 = arith.constant 0 : index
    %41 = vector.load %arg9[%c0_23, %c0_24] : memref<32x1xf32, #tpu.memory_space<vmem>>, vector<32x1xf32>
    %cst_25 = arith.constant dense<0.000000e+00> : vector<128xf32>
    %42 = vector.multi_reduction <add>, %39, %cst_25 [0] : vector<32x128xf32> to vector<128xf32>
    %43 = vector.shape_cast %42 : vector<128xf32> to vector<1x128xf32>
    %44 = arith.mulf %39, %39 : vector<32x128xf32>
    %cst_26 = arith.constant dense<0.000000e+00> : vector<128xf32>
    %45 = vector.multi_reduction <add>, %44, %cst_26 [0] : vector<32x128xf32> to vector<128xf32>
    %46 = vector.shape_cast %45 : vector<128xf32> to vector<1x128xf32>
    %cst_27 = arith.constant 3.125000e-02 : f32
    %47 = vector.broadcast %cst_27 : f32 to vector<1x128xf32>
    %48 = arith.mulf %43, %47 : vector<1x128xf32>
    %cst_28 = arith.constant 3.125000e-02 : f32
    %49 = vector.broadcast %cst_28 : f32 to vector<1x128xf32>
    %50 = arith.mulf %46, %49 : vector<1x128xf32>
    %51 = arith.mulf %48, %48 : vector<1x128xf32>
    %52 = arith.subf %50, %51 : vector<1x128xf32>
    %cst_29 = arith.constant 0.000000e+00 : f32
    %53 = vector.broadcast %cst_29 : f32 to vector<1x128xf32>
    %54 = arith.maximumf %52, %53 : vector<1x128xf32>
    %55 = vector.broadcast %48 : vector<1x128xf32> to vector<32x128xf32>
    %56 = arith.subf %39, %55 : vector<32x128xf32>
    %cst_30 = arith.constant 9.99999974E-6 : f32
    %57 = vector.broadcast %cst_30 : f32 to vector<1x128xf32>
    %58 = arith.addf %54, %57 : vector<1x128xf32>
    %59 = math.rsqrt %58 : vector<1x128xf32>
    %60 = vector.broadcast %59 : vector<1x128xf32> to vector<32x128xf32>
    %61 = arith.mulf %56, %60 : vector<32x128xf32>
    %62 = vector.broadcast %40 : vector<32x1xf32> to vector<32x128xf32>
    %63 = arith.mulf %61, %62 : vector<32x128xf32>
    %64 = vector.broadcast %41 : vector<32x1xf32> to vector<32x128xf32>
    %65 = arith.addf %63, %64 : vector<32x128xf32>
    %cst_31 = arith.constant 0.000000e+00 : f32
    %66 = vector.broadcast %cst_31 : f32 to vector<32x128xf32>
    %67 = arith.maximumf %65, %66 : vector<32x128xf32>
    %c0_32 = arith.constant 0 : index
    %c0_33 = arith.constant 0 : index
    %68 = vector.load %arg10[%c0_32, %c0_33] : memref<1x32xbf16, #tpu.memory_space<vmem>>, vector<1x32xbf16>
    %69 = arith.truncf %67 : vector<32x128xf32> to vector<32x128xbf16>
    %cst_34 = arith.constant dense<0.000000e+00> : vector<1x128xf32>
    %70 = tpu.matmul %68, %69, %cst_34 {dimension_numbers = #tpu.dot_dimension_numbers<[1], [0], [0], [1], [0, 0, 1, 1], [], []>} : vector<1x32xbf16>, vector<32x128xbf16>, vector<1x128xf32> -> vector<1x128xf32>
    %c0_35 = arith.constant 0 : index
    %c0_36 = arith.constant 0 : index
    %71 = memref.load %arg11[%c0_35, %c0_36] : memref<1x1xf32, #tpu.memory_space<smem>>
    %72 = vector.broadcast %71 : f32 to vector<1x128xf32>
    %73 = arith.addf %70, %72 : vector<1x128xf32>
    %c0_37 = arith.constant 0 : index
    %c0_38 = arith.constant 0 : index
    %74 = vector.load %arg12[%c0_37, %c0_38] : memref<1x128xf32, #tpu.memory_space<vmem>>, vector<1x128xf32>
    tpu.vector_store %arg12[%c0_37, %c0_38], %73 {strides = array<i32>} : memref<1x128xf32, #tpu.memory_space<vmem>>, vector<1x128xf32>,
    return
  }
  func.func @transform_0(%arg0: i32) -> (i32, i32) {
    %c0_i32 = arith.constant 0 : i32
    %c0_i32_0 = arith.constant 0 : i32
    return %c0_i32, %arg0 : i32, i32
  }
  func.func @transform_1(%arg0: i32) -> (i32, i32) {
    %c0_i32 = arith.constant 0 : i32
    %c0_i32_0 = arith.constant 0 : i32
    %c0_i32_1 = arith.constant 0 : i32
    return %c0_i32, %c0_i32_0 : i32, i32
  }
  func.func @transform_2(%arg0: i32) -> (i32, i32) {
    %c0_i32 = arith.constant 0 : i32
    %c0_i32_0 = arith.constant 0 : i32
    %c0_i32_1 = arith.constant 0 : i32
    return %c0_i32, %c0_i32_0 : i32, i32
  }
  func.func @transform_3(%arg0: i32) -> (i32, i32) {
    %c0_i32 = arith.constant 0 : i32
    %c0_i32_0 = arith.constant 0 : i32
    %c0_i32_1 = arith.constant 0 : i32
    return %c0_i32, %c0_i32_0 : i32, i32
  }
  func.func @transform_4(%arg0: i32) -> (i32, i32) {
    %c0_i32 = arith.constant 0 : i32
    %c0_i32_0 = arith.constant 0 : i32
    %c0_i32_1 = arith.constant 0 : i32
    return %c0_i32, %c0_i32_0 : i32, i32
  }
  func.func @transform_5(%arg0: i32) -> (i32, i32) {
    %c0_i32 = arith.constant 0 : i32
    %c0_i32_0 = arith.constant 0 : i32
    %c0_i32_1 = arith.constant 0 : i32
    return %c0_i32, %c0_i32_0 : i32, i32
  }
  func.func @transform_6(%arg0: i32) -> (i32, i32) {
    %c0_i32 = arith.constant 0 : i32
    %c0_i32_0 = arith.constant 0 : i32
    %c0_i32_1 = arith.constant 0 : i32
    return %c0_i32, %c0_i32_0 : i32, i32
  }
  func.func @transform_7(%arg0: i32) -> (i32, i32) {
    %c0_i32 = arith.constant 0 : i32
    %c0_i32_0 = arith.constant 0 : i32
    %c0_i32_1 = arith.constant 0 : i32
    return %c0_i32, %c0_i32_0 : i32, i32
  }
  func.func @transform_8(%arg0: i32) -> (i32, i32) {
    %c0_i32 = arith.constant 0 : i32
    %c0_i32_0 = arith.constant 0 : i32
    %c0_i32_1 = arith.constant 0 : i32
    return %c0_i32, %c0_i32_0 : i32, i32
  }
  func.func @transform_9(%arg0: i32) -> (i32, i32) {
    %c0_i32 = arith.constant 0 : i32
    %c0_i32_0 = arith.constant 0 : i32
    %c0_i32_1 = arith.constant 0 : i32
    return %c0_i32, %c0_i32_0 : i32, i32
  }
  func.func @transform_10(%arg0: i32) -> (i32, i32) {
    %c0_i32 = arith.constant 0 : i32
    %c0_i32_0 = arith.constant 0 : i32
    %c0_i32_1 = arith.constant 0 : i32
    return %c0_i32, %c0_i32_0 : i32, i32
  }
  func.func @transform_11(%arg0: i32) -> (i32, i32) {
    %c0_i32 = arith.constant 0 : i32
    %c0_i32_0 = arith.constant 0 : i32
    return %c0_i32, %arg0 : i32, i32
  }
}

</mosaic_0001>

<bundles_post_ra>
// kernel: tpu_custom_call.1
= control target key start
LH: loop header
LB: loop body
LE: loop exit
PB: predicated region body
PF: predicated region fallthrough
CT: control target
= control target key end

     0   :  { %vm98_vm0 = vcmask 1043456   ;;  %vm91_vm1 = vcmask 195584   ;;  %v591_v6 = vmov 0   ;;  %s771_s0 = inlined_call_operand.vmem [shape: bf16[24,128], index: 0, kind: input, shape index: {}]   ;;  %s772_s1 = inlined_call_operand.vmem [shape: bf16[32,24], index: 1, kind: input, shape index: {}]   ;;  %s773_s2 = inlined_call_operand.vmem [shape: f32[32,1], index: 2, kind: input, shape index: {}]   ;;  %s774_s3 = inlined_call_operand.vmem [shape: f32[32,1], index: 3, kind: input, shape index: {}]   ;;  %s775_s4 = inlined_call_operand.vmem [shape: f32[32,1], index: 4, kind: input, shape index: {}]   ;;  %s776_s5 = inlined_call_operand.vmem [shape: bf16[32,32], index: 5, kind: input, shape index: {}]   ;;  %s777_s6 = inlined_call_operand.vmem [shape: f32[32,1], index: 6, kind: input, shape index: {}]   ;;  %s778_s7 = inlined_call_operand.vmem [shape: f32[32,1], index: 7, kind: input, shape index: {}]   ;;  %s779_s8 = inlined_call_operand.vmem [shape: f32[32,1], index: 8, kind: input, shape index: {}]   ;;  %s780_s9 = inlined_call_operand.vmem [shape: bf16[1,32], index: 9, kind: input, shape index: {}]   ;;  %s781_s10 = inlined_call_operand.<no memory space> [shape: f32[1,1], index: 10, kind: input, shape index: {}]   ;;  %s782_s11 = inlined_call_operand.hbm [shape: f32[1,128], index: 11, kind: output, shape index: {}]  }
   0x1   :  { %v557_v0 = vld [vmem:[%s771_s0] sm:$0xff]   ;;  %v558_v1 = vld [vmem:[%s771_s0 + $0x8] ss:$0 sps:$4 sm:$0xff]   ;;  %v50_v5 = vld [vmem:[%s773_s2 + $0x10] sm:$0xff]  ;;  %555 = vset.pattern.permute.xlu0 %v591_v6  ;;  %556 = vset.pattern.permute.xlu1 %v591_v6 }
   0x2   :  { %526 = vmatprep.subr.bf16.mxu0 %v557_v0  ;;  %v559_v2 = vld [vmem:[%s772_s1] sm:$0xff]   ;;  %v100_v4 = vsel %vm98_vm0, %v558_v1, 0  ;;  %v560_v7 = vld [vmem:[%s772_s1 + $0x8] sm:$0xff]   ;;  %64 = vperm.xlu1 %556, %v50_v5   ;;  %v51_v9 = vld [vmem:[%s773_s2 + $0x18] sm:$0xff] }
   0x3   :  { %527 = vmatpush3.bf16.msra.mxu0 %v557_v0  ;;  %v48_v3 = vld [vmem:[%s773_s2] sm:$0xff]  ;;  %530 = vmatprep.mubr.msk.bf16.mxu0 %vm91_vm1, %v559_v2  ;;  %v49_v8 = vld [vmem:[%s773_s2 + $0x8] sm:$0xff] }
   0x4   :  { %550 = vmatprep.subr.msk.bf16.mxu0 %vm98_vm0, %v558_v1  ;;  %54 = vperm.xlu0 %555, %v48_v3   ;;  %v151_v10 = vld [vmem:[%s774_s3] sm:$0xff]  ;;  %v152_v11 = vld [vmem:[%s774_s3 + $0x8] sm:$0xff] }
   0x6   :  { %69 = vperm.xlu1 %556, %v51_v9  }
   0x7   :  { %529 = vmatpush3.bf16.msra.mxu0 %v100_v4 }
   0x8   :  { %59 = vperm.xlu0 %555, %v49_v8  }
   0xa   :  { %531 = vmatmul.mubr.msk.bf16.vlgmr.msra.gmra.mrb[0].mxu0 %vm91_vm1, %v560_v7 }
   0xb   :  { %17 = vsyncpa [#allocation4], 0  ;;  %203 = vperm.xlu1 %556, %v152_v11   ;;  %v155_v12 = vld [vmem:[%s775_s4] sm:$0xff]  ;;  %v156_v13 = vld [vmem:[%s775_s4 + $0x8] sm:$0xff]  ;;  %vm288_vm2 = vcmask 261120   ;;  %vm593_vm3 = vmmov 0  }
   0xc   :  { %198 = vperm.xlu0 %555, %v151_v10   ;;  %v153_v14 = vld [vmem:[%s774_s3 + $0x10] sm:$0xff]  ;;  %v154_v15 = vld [vmem:[%s774_s3 + $0x18] sm:$0xff]  ;;  %v254_v18 = vld [vmem:[%s777_s6] sm:$0xff]  ;;  %s594_s3 = smov [#allocation3]  }
   0xd   :  { %v157_v16 = vld [vmem:[%s775_s4 + $0x10] sm:$0xff]  ;;  %v158_v17 = vld [vmem:[%s775_s4 + $0x18] sm:$0xff]  ;;  %v255_v19 = vld [vmem:[%s777_s6 + $0x8] sm:$0xff]  ;;  %s496_s30 = sshll.u32 %s594_s3, 4  ;;  %s497_s30 = int_to_ptr.vmem [resolvable:$true] %s496_s30 }
   0xe   :  { %v256_v20 = vld [vmem:[%s777_s6 + $0x10] sm:$0xff]  ;;  %v257_v21 = vld [vmem:[%s777_s6 + $0x18] sm:$0xff]  ;;  %v344_v22 = vld [vmem:[%s778_s7] sm:$0xff]  ;;  %s567_s12 = scalar_lea.vmem %s497_s30, 16  ;;  %s571_s13 = scalar_lea.vmem %s497_s30, 32 }
   0xf   :  { %227 = vperm.xlu1 %556, %v156_v13   ;;  %v345_v23 = vld [vmem:[%s778_s7 + $0x8] sm:$0xff]  ;;  %v348_v24 = vld [vmem:[%s779_s8] sm:$0xff]  ;;  %v346_v26 = vld [vmem:[%s778_s7 + $0x10] sm:$0xff]  ;;  %p568_p0 = scmp.ne.s32.totalorder %s497_s30, %s567_s12  ;;  %p572_p1 = scmp.lt.s32.totalorder %s497_s30, %s497_s30 }
  0x10   :  { %222 = vperm.xlu0 %555, %v155_v12   ;;  %v349_v25 = vld [vmem:[%s779_s8 + $0x8] sm:$0xff]  ;;  %v347_v27 = vld [vmem:[%s778_s7 + $0x18] sm:$0xff]  ;;  %v350_v28 = vld [vmem:[%s779_s8 + $0x10] sm:$0xff]  ;;  %p573_p2 = scmp.lt.s32.totalorder %s571_s13, %s567_s12 }
  0x11   :  { %v351_v29 = vld [vmem:[%s779_s8 + $0x18] sm:$0xff]  ;;  %v561_v30 = vld [vmem:[%s776_s5] sm:$0xff]  }
  0x12   :  { %538 = vmatprep.mubr.msk.bf16.mxu1 %vm288_vm2, %v561_v30  ;;  %p574_p3 = por %p573_p2, %p572_p1 }
  0x13   :  { %213 = vperm.xlu1 %556, %v154_v15  }
  0x14   :  { %208 = vperm.xlu0 %555, %v153_v14   ;;  %p575_p4 = pnand %p574_p3, %p568_p0 }
  0x17   :  { %237 = vperm.xlu1 %556, %v158_v17  }
  0x18   :  { %232 = vperm.xlu0 %555, %v157_v16  }
  0x1b   :  { %265 = vperm.xlu1 %556, %v255_v19  }
  0x1c   :  { %260 = vperm.xlu0 %555, %v254_v18  }
  0x1f   :  { %275 = vperm.xlu1 %556, %v257_v21  }
  0x20   :  { %270 = vperm.xlu0 %555, %v256_v20  }
  0x23   :  { %396 = vperm.xlu1 %556, %v345_v23  }
  0x24   :  { %391 = vperm.xlu0 %555, %v344_v22  }
  0x27   :  { %420 = vperm.xlu1 %556, %v349_v25  }
  0x28   :  { %415 = vperm.xlu0 %555, %v348_v24  }
  0x2b   :  { %406 = vperm.xlu1 %556, %v347_v27  }
  0x2c   :  { %401 = vperm.xlu0 %555, %v346_v26  }
  0x2f   :  { %430 = vperm.xlu1 %556, %v351_v29  }
  0x30   :  { %425 = vperm.xlu0 %555, %v350_v28  }
  0x81   :  { %v65_v32 = vpop.permute.xlu1 %64 }
  0x83   :  { %v55_v31 = vpop.permute.xlu0 %54 }
  0x85   :  { %v70_v41 = vpop.permute.xlu1 %69 }
  0x87   :  { %v60_v37 = vpop.permute.xlu0 %59 }
  0x8a   :  { %v204_v10 = vpop.permute.xlu1 %203 }
  0x8b   :  { %v199_v9 = vpop.permute.xlu0 %198 }
  0x8e   :  { %v228_v14 = vpop.permute.xlu1 %227 }
  0x8f   :  { %v223_v13 = vpop.permute.xlu0 %222 }
  0x92   :  { %v214_v16 = vpop.permute.xlu1 %213 }
  0x93   :  { %v209_v15 = vpop.permute.xlu0 %208 }
  0x96   :  { %v238_v27 = vpop.permute.xlu1 %237 }
  0x97   :  { %v233_v26 = vpop.permute.xlu0 %232 }
  0xdd   :  { %v532_v33 = vpop.f32.mrb[0].mxu0 }
  0xde   :  { %v136_v34 = vpop.f32.mrb[1].mxu0  ;;  %v145_v39 = vadd.f32 %v532_v33, %v65_v32 }
  0xdf   :  { %v137_v35 = vadd.f32 %v136_v34, %v55_v31  ;;  %v533_v36 = vpop.f32.mrb[2].mxu0 }
  0xe0   :  { %v139_v38 = vpop.f32.mrb[3].mxu0  ;;  %v148_v43 = vadd.f32 %v533_v36, %v70_v41  ;;  %v170_v46 = vmul.f32 %v145_v39, %v145_v39  ;;  %v266_v41 = vpop.permute.xlu1 %265 }
  0xe1   :  { %v140_v40 = vadd.f32 %v139_v38, %v60_v37  ;;  %v168_v42 = vmul.f32 %v137_v35, %v137_v35  ;;  %v562_v38 = vld [vmem:[%s776_s5 + $0x8] sm:$0xff]  }
  0xe2   :  { %v171_v49 = vmul.f32 %v148_v43, %v148_v43 }
  0xe3   :  { %v159_v44 = vadd.f32 %v140_v40, %v137_v35  ;;  %v169_v45 = vmul.f32 %v140_v40, %v140_v40 }
  0xe5   :  { %v160_v47 = vadd.f32 %v159_v44, %v145_v39  ;;  %v172_v48 = vadd.f32 %v169_v45, %v168_v42 }
  0xe7   :  { %v161_v50 = vadd.f32 %v160_v47, %v148_v43  ;;  %v173_v51 = vadd.f32 %v172_v48, %v170_v46 }
  0xe9   :  { %v162_v52 = vrot.slane %v161_v50, 4  ;;  %v174_v53 = vadd.f32 %v173_v51, %v171_v49 }
  0xeb   :  { %v163_v54 = vadd.f32 %v162_v52, %v161_v50  ;;  %v175_v55 = vrot.slane %v174_v53, 4  ;;  %v276_v50 = vpop.permute.xlu1 %275 }
  0xed   :  { %v164_v56 = vrot.slane %v163_v54, 2  ;;  %v176_v57 = vadd.f32 %v175_v55, %v174_v53 }
  0xef   :  { %v165_v58 = vadd.f32 %v164_v56, %v163_v54  ;;  %v177_v59 = vrot.slane %v176_v57, 2 }
  0xf1   :  { %v166_v60 = vrot.slane %v165_v58, 1  ;;  %v178_v61 = vadd.f32 %v177_v59, %v176_v57 }
  0xf3   :  { %v167_v62 = vadd.f32 %v166_v60, %v165_v58  ;;  %v179_v63 = vrot.slane %v178_v61, 1 }
  0xf5   :  { %v180_v0 = vadd.f32 %v179_v63, %v178_v61  ;;  %v181_v1 = vmul.f32 0.03125, %v167_v62 }
  0xf7   :  { %v182_v2 = vmul.f32 0.03125, %v180_v0  ;;  %v183_v3 = vmul.f32 %v181_v1, %v181_v1  ;;  %v187_v4 = vsub.f32 %v140_v40, %v181_v1  ;;  %v186_v5 = vsub.f32 %v137_v35, %v181_v1  ;;  %v261_v40 = vpop.permute.xlu0 %260 }
  0xf8   :  { %v188_v6 = vsub.f32 %v145_v39, %v181_v1  ;;  %v189_v7 = vsub.f32 %v148_v43, %v181_v1  ;;  %v592_v39 = vmov 0.0  }
  0xf9   :  { %v184_v8 = vsub.f32 %v182_v2, %v183_v3  ;;  %542 = vmatprep.subr.bf16.mxu0 %v592_v39  ;;  %546 = vmatprep.mubr.msk.bf16.mxu0 %vm593_vm3, %v592_v39 }
  0xfb   :  { %v185_v11 = vmax.f32 %v184_v8, 0.0  ;;  %v271_v46 = vpop.permute.xlu0 %270 }
  0xfd   :  { %v190_v12 = vadd.f32 1e-05, %v185_v11 }
  0xff   :  { %563 = vrsqrt.f32 %v190_v12 }
 0x109   :  { %v564_v17 = vpop.eup %563 }
 0x10a   :  { %v193_v18 = vmul.f32 %v564_v17, %v187_v4  ;;  %v192_v19 = vmul.f32 %v564_v17, %v186_v5  ;;  %v194_v20 = vmul.f32 %v564_v17, %v188_v6  ;;  %v195_v21 = vmul.f32 %v564_v17, %v189_v7 }
 0x10c   :  { %v216_v22 = vmul.f32 %v199_v9, %v192_v19  ;;  %v217_v23 = vmul.f32 %v204_v10, %v193_v18  ;;  %v218_v24 = vmul.f32 %v209_v15, %v194_v20  ;;  %v219_v25 = vmul.f32 %v214_v16, %v195_v21  ;;  %v392_v18 = vpop.permute.xlu0 %391  ;;  %v397_v19 = vpop.permute.xlu1 %396 }
 0x10e   :  { %v240_v28 = vadd.f32 %v223_v13, %v216_v22  ;;  %v241_v29 = vadd.f32 %v228_v14, %v217_v23  ;;  %v242_v30 = vadd.f32 %v233_v26, %v218_v24  ;;  %v243_v31 = vadd.f32 %v238_v27, %v219_v25 }
 0x110   :  { %v244_v32 = vmax.f32 %v240_v28, 0.0  ;;  %v245_v33 = vmax.f32 %v241_v29, 0.0  ;;  %v246_v34 = vmax.f32 %v242_v30, 0.0  ;;  %v247_v35 = vmax.f32 %v243_v31, 0.0  ;;  %v416_v22 = vpop.permute.xlu0 %415  ;;  %v421_v23 = vpop.permute.xlu1 %420 }
 0x112   :  { %v252_v36 = vpack.c.bf16 %v245_v33, %v244_v32  ;;  %v253_v37 = vpack.c.bf16 %v247_v35, %v246_v34 }
 0x114   :  { %534 = vmatprep.subr.bf16.mxu1 %v252_v36  ;;  %v402_v24 = vpop.permute.xlu0 %401  ;;  %v407_v25 = vpop.permute.xlu1 %406 }
 0x115   :  { %535 = vmatpush3.bf16.msra.mxu1 %v252_v36 }
 0x116   :  { %536 = vmatprep.subr.bf16.mxu1 %v253_v37 }
 0x118   :  { %v426_v35 = vpop.permute.xlu0 %425  ;;  %v431_v36 = vpop.permute.xlu1 %430 }
 0x119   :  { %537 = vmatpush3.bf16.msra.mxu1 %v253_v37 }
 0x11c   :  { %539 = vmatmul.mubr.msk.bf16.vlgmr.msra.gmra.mrb[0].mxu1 %vm288_vm2, %v562_v38 }
 0x1ef   :  { %v540_v42 = vpop.f32.mrb[0].mxu1 }
 0x1f0   :  { %v329_v43 = vpop.f32.mrb[1].mxu1  ;;  %v338_v48 = vadd.f32 %v540_v42, %v271_v46 }
 0x1f1   :  { %v330_v44 = vadd.f32 %v329_v43, %v261_v40  ;;  %v541_v45 = vpop.f32.mrb[2].mxu1 }
 0x1f2   :  { %v332_v47 = vpop.f32.mrb[3].mxu1  ;;  %v341_v52 = vadd.f32 %v541_v45, %v276_v50  ;;  %v363_v55 = vmul.f32 %v338_v48, %v338_v48 }
 0x1f3   :  { %v333_v49 = vadd.f32 %v332_v47, %v266_v41  ;;  %v361_v51 = vmul.f32 %v330_v44, %v330_v44 }
 0x1f4   :  { %v364_v58 = vmul.f32 %v341_v52, %v341_v52 }
 0x1f5   :  { %v352_v53 = vadd.f32 %v333_v49, %v330_v44  ;;  %v362_v54 = vmul.f32 %v333_v49, %v333_v49 }
 0x1f7   :  { %v353_v56 = vadd.f32 %v352_v53, %v338_v48  ;;  %v365_v57 = vadd.f32 %v362_v54, %v361_v51 }
 0x1f9   :  { %v354_v59 = vadd.f32 %v353_v56, %v341_v52  ;;  %v366_v60 = vadd.f32 %v365_v57, %v363_v55 }
 0x1fb   :  { %v355_v61 = vrot.slane %v354_v59, 4  ;;  %v367_v62 = vadd.f32 %v366_v60, %v364_v58 }
 0x1fd   :  { %v356_v63 = vadd.f32 %v355_v61, %v354_v59  ;;  %v368_v0 = vrot.slane %v367_v62, 4 }
 0x1ff   :  { %v357_v1 = vrot.slane %v356_v63, 2  ;;  %v369_v2 = vadd.f32 %v368_v0, %v367_v62 }
 0x201   :  { %v358_v3 = vadd.f32 %v357_v1, %v356_v63  ;;  %v370_v4 = vrot.slane %v369_v2, 2 }
 0x203   :  { %v359_v5 = vrot.slane %v358_v3, 1  ;;  %v371_v6 = vadd.f32 %v370_v4, %v369_v2 }
 0x205   :  { %v360_v7 = vadd.f32 %v359_v5, %v358_v3  ;;  %v372_v8 = vrot.slane %v371_v6, 1 }
 0x207   :  { %v373_v9 = vadd.f32 %v372_v8, %v371_v6  ;;  %v374_v10 = vmul.f32 0.03125, %v360_v7 }
 0x209   :  { %v375_v11 = vmul.f32 0.03125, %v373_v9  ;;  %v376_v12 = vmul.f32 %v374_v10, %v374_v10  ;;  %v380_v13 = vsub.f32 %v333_v49, %v374_v10  ;;  %v379_v14 = vsub.f32 %v330_v44, %v374_v10 }
 0x20a   :  { %v381_v15 = vsub.f32 %v338_v48, %v374_v10  ;;  %v382_v16 = vsub.f32 %v341_v52, %v374_v10  ;;  %v441_v48 = vld [vmem:[%s780_s9] sm:$0x1]  ;;  %v445_v49 = vstv %s781_s10 }
 0x20b   :  { %v377_v17 = vsub.f32 %v375_v11, %v376_v12 }
 0x20d   :  { %v378_v20 = vmax.f32 %v377_v17, 0.0 }
 0x20f   :  { %v383_v21 = vadd.f32 1e-05, %v378_v20 }
 0x211   :  { %565 = vrsqrt.f32 %v383_v21 }
 0x21b   :  { %v566_v26 = vpop.eup %565 }
 0x21c   :  { %v386_v27 = vmul.f32 %v566_v26, %v380_v13  ;;  %v385_v28 = vmul.f32 %v566_v26, %v379_v14  ;;  %v387_v29 = vmul.f32 %v566_v26, %v381_v15  ;;  %v388_v30 = vmul.f32 %v566_v26, %v382_v16 }
 0x21e   :  { %v410_v31 = vmul.f32 %v397_v19, %v386_v27  ;;  %v409_v32 = vmul.f32 %v392_v18, %v385_v28  ;;  %v411_v33 = vmul.f32 %v402_v24, %v387_v29  ;;  %v412_v34 = vmul.f32 %v407_v25, %v388_v30 }
 0x220   :  { %v433_v37 = vadd.f32 %v416_v22, %v409_v32  ;;  %v434_v38 = vadd.f32 %v421_v23, %v410_v31  ;;  %v435_v40 = vadd.f32 %v426_v35, %v411_v33  ;;  %v436_v41 = vadd.f32 %v431_v36, %v412_v34 }
 0x222   :  { %v437_v42 = vmax.f32 %v433_v37, 0.0  ;;  %v438_v43 = vmax.f32 %v434_v38, 0.0  ;;  %v439_v44 = vmax.f32 %v435_v40, 0.0  ;;  %v440_v45 = vmax.f32 %v436_v41, 0.0 }
 0x224   :  { %v442_v46 = vpack.c.bf16 %v438_v43, %v437_v42  ;;  %v443_v47 = vpack.c.bf16 %v440_v45, %v439_v44 }
 0x226   :  { %543 = vmatpush3.bf16.msra.mxu0 %v442_v46 }
 0x227   :  { %544 = vmatprep.subr.bf16.mxu0 %v592_v39 }
 0x22a   :  { %545 = vmatpush3.bf16.msra.mxu0 %v443_v47 }
 0x22d   :  { %547 = vmatmul.mubr.msk.bf16.vlgmr.msra.gmra.mrb[4].mxu0 %vm288_vm2, %v441_v48 }
 0x300   :  { %v483_v50 = vpop.f32.mrb[4].mxu0 }
 0x301   :  { %v484_v51 = vadd.f32 %v483_v50, %v445_v49  ;;  %v548_v52 = vpop.f32.mrb[5].mxu0 }
 0x302   :  { %v486_v53 = vpop.f32.mrb[6].mxu0 }
 0x303   :  { %489 = vst [vmem:[#allocation3] sm:$0x1] %v484_v51  ;;  %v549_v39 = vpop.f32.mrb[7].mxu0 }
 0x304   :  { %578 = shalt.err (!%p575_p4)
}
 0x305   :  { %s579_s10 = scalar_lea.hbm %s782_s11, 16 }
 0x306   :  { %p580_p5 = scmp.ne.s32.totalorder %s782_s11, %s579_s10  ;;  %p583_p6 = scmp.lt.u32.totalorder %s579_s10, %s782_s11 }
 0x308   :  { %p585_p7 = pnand %p583_p6, %p580_p5 }
 0x30a   :  { %588 = shalt.err (!%p585_p7)
}
 0x30b   :  { %499 = dma.vmem_to_hbm [thread:$0]  %s497_s30, 16, %s782_s11, [#allocation4]  }
 0x30c   :  { %589 = dma.done.wait [#allocation4], 16  }
 0x30d   :  { %590 = vsyncadd [#allocation4], 4294967280 }
 0x30e   :  { %503 = vsyncpa [#allocation4], 1 }

</bundles_post_ra>
